<compile_context>
chip_gen: v7x
topology: tpu7x:2x2x1
jax: 0.10.0
libtpu: 0.0.40
codegen_flags: <defaults>
</compile_context>

<pallas_src>
import functools
import numpy as np
import jax
import jax.numpy as jnp
from jax import lax
from jax.experimental import pallas as pl
from jax.experimental.pallas import tpu as pltpu


# ----------------------------------------------------------------------------
# helpers
# ----------------------------------------------------------------------------
def _round_up(x, m):
    return ((x + m - 1) // m) * m


def _cdiv(a, b):
    return -(-a // b)


def _wants_row_split():
    """True only on chips with 2 TensorCores sharing the grid (v7x-like)."""
    try:
        kind = jax.devices()[0].device_kind.lower()
    except Exception:
        return False
    return ("v7" in kind) or ("tpu7" in kind)


def _pick_tiles(n_rows, n_red, split_rows):
    """Generation-aware tile sizes. Row split only when it fills both TCs."""
    rows8 = _round_up(max(n_rows, 1), 8)
    n_i = _cdiv(rows8, 512)                    # cap tm at 512
    if split_rows and rows8 >= 256:
        n_i = max(n_i, 2)                      # each v7x TC gets >=128 rows
    tm = _round_up(_cdiv(rows8, n_i), 8)

    red128 = _round_up(max(n_red, 1), 128)
    n_k = _cdiv(red128, 2048)                  # cap tk at 2048
    tk = _round_up(_cdiv(red128, n_k), 128)    # minimizes column padding
    return tm, tk


# ----------------------------------------------------------------------------
# Pallas kernel: fused normalized aggregation
#   feats = diag(1/sqrt(rowdeg)) @ mask @ [embed * 1/sqrt(coldeg)]   (prescaled)
#   mask_row (optional) = mask * (1/rowdeg)
# ----------------------------------------------------------------------------
def _agg_body(mask_ref, isr_ref, ir_ref, emb_ref, feats_ref, mrow_ref, *,
              emb_resident, tk):
    k = pl.program_id(1)

    @pl.when(k == 0)
    def _init():
        feats_ref[...] = jnp.zeros_like(feats_ref)

    m = mask_ref[...]                              # (tm, tk), compute dtype
    if emb_resident:
        off = pl.multiple_of(k * tk, 128)          # slice of resident table
        e = emb_ref[pl.ds(off, tk), :]
    else:
        e = emb_ref[...]                           # (tk, F) streamed tile
    # Pure MXU matmul accumulating into the VMEM-resident f32 output block.
    feats_ref[...] += jnp.dot(m, e, preferred_element_type=jnp.float32)

    if mrow_ref is not None:                       # mean-normalized mask tile
        mrow_ref[...] = (m.astype(jnp.float32) * ir_ref[...]
                         ).astype(mrow_ref.dtype)

    @pl.when(k == pl.num_programs(1) - 1)
    def _finalize():
        feats_ref[...] = feats_ref[...] * isr_ref[...]   # row 1/sqrt(deg)


def _agg_kernel(mask_ref, isr_ref, emb_ref, feats_ref, *, emb_resident, tk):
    _agg_body(mask_ref, isr_ref, None, emb_ref, feats_ref, None,
              emb_resident=emb_resident, tk=tk)


def _agg_kernel_mrow(mask_ref, isr_ref, ir_ref, emb_ref, feats_ref, mrow_ref,
                     *, emb_resident, tk):
    _agg_body(mask_ref, isr_ref, ir_ref, emb_ref, feats_ref, mrow_ref,
              emb_resident=emb_resident, tk=tk)


def gcn_aggregate(mask, embed, *, compute_dtype=jnp.bfloat16,
                  need_mask_row=False, mask_row_dtype=jnp.float32,
                  tm=None, tk=None):
    """(mask/sqrt(rowdeg)/sqrt(coldeg)) @ embed  [+ mask/rowsum]  fused."""
    mask = jnp.asarray(mask, jnp.float32)
    embed = jnp.asarray(embed, jnp.float32)
    n_rows, n_uniq = mask.shape
    assert embed.shape[0] == n_uniq
    feat_dim = embed.shape[1]

    # Degree vectors (tiny reductions) + reciprocals computed once in f32.
    # max(.,1) guards zero-degree rows/cols (possible for mask_neigh).
    rsum = jnp.maximum(jnp.sum(mask, axis=1, keepdims=True), 1.0)   # (rows, 1)
    csum = jnp.maximum(jnp.sum(mask, axis=0), 1.0)                  # (uniq,)
    inv_sqrt_r = lax.rsqrt(rsum)                                    # (rows, 1)
    inv_r = 1.0 / rsum                                              # (rows, 1)
    # Fold column normalization into the embed table (fuses with the cast,
    # avoids double rounding and all per-step VPU work in the kernel).
    emb_scaled = (embed * lax.rsqrt(csum)[:, None]).astype(compute_dtype)

    tm_d, tk_d = _pick_tiles(n_rows, n_uniq, _wants_row_split())
    tm = tm or tm_d
    tk = tk or tk_d
    rows_p = _round_up(n_rows, tm)
    uniq_p = _round_up(n_uniq, tk)

    mask_p = jnp.pad(mask.astype(compute_dtype),
                     ((0, rows_p - n_rows), (0, uniq_p - n_uniq)))
    emb_p = jnp.pad(emb_scaled, ((0, uniq_p - n_uniq), (0, 0)))
    isr_p = jnp.pad(inv_sqrt_r, ((0, rows_p - n_rows), (0, 0)),
                    constant_values=1.0)

    # Keep the (column-scaled) embed table fully VMEM-resident when small:
    # fetched from HBM once instead of once per row tile.
    itemsize = jnp.dtype(compute_dtype).itemsize
    emb_full_bytes = uniq_p * feat_dim * itemsize
    emb_resident = emb_full_bytes * 2 <= 8 * 2**20

    grid = (rows_p // tm, uniq_p // tk)
    in_specs = [
        pl.BlockSpec((tm, tk), lambda i, k: (i, k)),      # mask tile (streamed)
        pl.BlockSpec((tm, 1), lambda i, k: (i, 0)),       # 1/sqrt(rowdeg)
    ]
    operands = [mask_p, isr_p]
    if need_mask_row:
        ir_p = jnp.pad(inv_r, ((0, rows_p - n_rows), (0, 0)),
                       constant_values=1.0)
        in_specs.append(pl.BlockSpec((tm, 1), lambda i, k: (i, 0)))  # 1/rowdeg
        operands.append(ir_p)
    if emb_resident:
        in_specs.append(pl.BlockSpec((uniq_p, feat_dim), lambda i, k: (0, 0)))
    else:
        in_specs.append(pl.BlockSpec((tk, feat_dim), lambda i, k: (k, 0)))
    operands.append(emb_p)

    feats_spec = pl.BlockSpec((tm, feat_dim), lambda i, k: (i, 0))
    if need_mask_row:
        kernel = functools.partial(_agg_kernel_mrow,
                                   emb_resident=emb_resident, tk=tk)
        out_shape = (jax.ShapeDtypeStruct((rows_p, feat_dim), jnp.float32),
                     jax.ShapeDtypeStruct((rows_p, uniq_p), mask_row_dtype))
        out_specs = (feats_spec, pl.BlockSpec((tm, tk), lambda i, k: (i, k)))
    else:
        kernel = functools.partial(_agg_kernel,
                                   emb_resident=emb_resident, tk=tk)
        out_shape = jax.ShapeDtypeStruct((rows_p, feat_dim), jnp.float32)
        out_specs = feats_spec

    # VMEM budget estimate (double-buffered tiles) -> scoped limit.
    mrow_bytes = (tm * tk * jnp.dtype(mask_row_dtype).itemsize
                  if need_mask_row else 0)
    est = (2 * tm * tk * itemsize
           + 2 * (emb_full_bytes if emb_resident else tk * feat_dim * itemsize)
           + 2 * tm * feat_dim * 4
           + 2 * mrow_bytes + (1 << 20))
    vmem_limit = int(min(48 * 2**20, max(32 * 2**20, 2 * est)))

    res = pl.pallas_call(
        kernel,
        out_shape=out_shape,
        grid=grid,
        in_specs=in_specs,
        out_specs=out_specs,
        compiler_params=pltpu.CompilerParams(
            dimension_semantics=("parallel", "arbitrary"),
            vmem_limit_bytes=vmem_limit),
    )(*operands)

    if need_mask_row:
        feats, mrow = res
        if rows_p != n_rows:
            feats = feats[:n_rows]
        if rows_p != n_rows or uniq_p != n_uniq:
            mrow = mrow[:n_rows, :n_uniq]
        return feats, mrow
    feats = res if rows_p == n_rows else res[:n_rows]
    return feats, None


# ----------------------------------------------------------------------------
# GCNAggregator.forward glue
# TODO(synk): the set-union / dict relabelling that builds the dense neighbor
# masks and the features(node_ids) row gather are data-dependent host-side
# preprocessing with no clean Pallas equivalent; they stay in Python / XLA.
# ----------------------------------------------------------------------------
def _dense_mask(neigh_sets, universe):
    idx = {n: i for i, n in enumerate(universe)}
    m = np.zeros((len(neigh_sets), len(universe)), np.float32)
    for i, sn in enumerate(neigh_sets):
        m[i, [idx[n] for n in sn]] = 1.0
    return m


def _batch_masks(nodes, to_neighs, adj_list, train_flag):
    samp = [set(sn) | {int(nodes[i])} for i, sn in enumerate(to_neighs)]
    uniq = sorted(set.union(*samp))
    mask = _dense_mask(samp, uniq)
    mask_neigh, uniq_exp = None, None
    if train_flag:
        samp2 = [set(adj_list[n]) for n in uniq]
        uniq_exp = sorted(set.union(*samp2))
        mask_neigh = _dense_mask(samp2, uniq_exp)
    return mask, uniq, mask_neigh, uniq_exp


def gcn_aggregator_forward(feat_table, nodes, to_neighs, adj_list,
                           train_flag=True, compute_dtype=jnp.bfloat16):
    """Mirrors GCNAggregator.forward: returns (to_feats, to_feats_neigh, mask_row)."""
    mask, uniq, mask_neigh, uniq_exp = _batch_masks(nodes, to_neighs, adj_list,
                                                    train_flag)
    embed = feat_table[np.asarray(uniq)]                 # features(unique_nodes)
    to_feats, mask_row = gcn_aggregate(mask, embed, compute_dtype=compute_dtype,
                                       need_mask_row=True)
    to_feats_neigh = None
    if train_flag:
        embed_exp = feat_table[np.asarray(uniq_exp)]     # features(expanded)
        to_feats_neigh, _ = gcn_aggregate(mask_neigh, embed_exp,
                                          compute_dtype=compute_dtype)
    return to_feats, to_feats_neigh, mask_row


if __name__ == "__main__":
    N_TOTAL = 200      # total graph nodes
    FEAT = 128         # feature dim (lane-dense)
    BATCH = 96         # nodes in the batch

    key = jax.random.PRNGKey(0)
    k_feat, k_adj = jax.random.split(key)
    feat_table = jax.random.normal(k_feat, (N_TOTAL, FEAT), jnp.float32)

    # deterministic random symmetric graph with no isolated nodes
    adj = np.array(jax.random.uniform(k_adj, (N_TOTAL, N_TOTAL)) > 0.94)
    adj = np.logical_or(adj, adj.T)
    np.fill_diagonal(adj, False)
    for i in range(N_TOTAL):                   # ring edges -> degree >= 2
        adj[i, (i + 1) % N_TOTAL] = True
        adj[(i + 1) % N_TOTAL, i] = True
    adj_list = {n: set(np.nonzero(adj[n])[0].tolist()) for n in range(N_TOTAL)}

    nodes = list(range(BATCH))
    to_neighs = [adj_list[n] for n in nodes]

    # ------------- reference (float64 numpy, exactly the module math) -------
    mask, uniq, mask_neigh, uniq_exp = _batch_masks(nodes, to_neighs, adj_list, True)
    feat_np = np.asarray(feat_table, np.float64)

    def ref_norm(m):
        r = m.sum(1, keepdims=True)
        c = m.sum(0, keepdims=True)
        return m / np.sqrt(r) / np.sqrt(c), m / r

    m_norm, mask_row_ref = ref_norm(mask.astype(np.float64))
    to_feats_ref = m_norm @ feat_np[np.asarray(uniq)]
    mn_norm, _ = ref_norm(mask_neigh.astype(np.float64))
    to_feats_neigh_ref = mn_norm @ feat_np[np.asarray(uniq_exp)]

    # ------------- f32-compute check (tight) -------------------------------
    tf32, mr32 = gcn_aggregate(mask, feat_table[np.asarray(uniq)],
                               compute_dtype=jnp.float32, need_mask_row=True)
    jax.block_until_ready((tf32, mr32))
    assert np.allclose(np.asarray(tf32), to_feats_ref, atol=5e-3, rtol=5e-3)
    assert np.allclose(np.asarray(mr32), mask_row_ref, atol=1e-6, rtol=1e-6)

    # ------------- full forward, bf16 operands / f32 accumulation ----------
    to_feats, to_feats_neigh, mask_row = gcn_aggregator_forward(
        feat_table, nodes, to_neighs, adj_list, train_flag=True)
    jax.block_until_ready((to_feats, to_feats_neigh, mask_row))

    assert to_feats.shape == (BATCH, FEAT)
    assert mask_row.shape == (BATCH, len(uniq))
    assert to_feats_neigh.shape == (len(uniq), FEAT)
    assert np.allclose(np.asarray(to_feats), to_feats_ref, atol=5e-2, rtol=5e-2)
    assert np.allclose(np.asarray(to_feats_neigh), to_feats_neigh_ref,
                       atol=5e-2, rtol=5e-2)
    assert np.allclose(np.asarray(mask_row), mask_row_ref, atol=1e-6, rtol=1e-6)

    print("KERNEL_OK")
</pallas_src>

<mosaic_0001>
module attributes {stable_mosaic.version = 11 : i64} {
  func.func @_agg_kernel_mrow(%arg0: i32, %arg1: i32, %arg2: memref<96x256xf32, #tpu.memory_space<vmem>>, %arg3: memref<96x1xf32, #tpu.memory_space<vmem>>, %arg4: memref<96x1xf32, #tpu.memory_space<vmem>>, %arg5: memref<256x128xf32, #tpu.memory_space<vmem>>, %arg6: memref<96x128xf32, #tpu.memory_space<vmem>>, %arg7: memref<96x256xf32, #tpu.memory_space<vmem>>) attributes {dimension_semantics = [#tpu.dimension_semantics<parallel>, #tpu.dimension_semantics<arbitrary>], iteration_bounds = array<i64: 1, 1>, scalar_prefetch = 0 : i64, scratch_operands = 0 : i64, tpu.core_type = #tpu.core_type<tc>, window_params = [{transform_indices = @transform_0, window_bounds = array<i64: 96, 256>}, {transform_indices = @transform_1, window_bounds = array<i64: 96, 1>}, {transform_indices = @transform_2, window_bounds = array<i64: 96, 1>}, {pipeline_mode = #tpu.pipeline_mode<synchronous>, transform_indices = @transform_3, window_bounds = array<i64: 256, 128>}, {transform_indices = @transform_4, window_bounds = array<i64: 96, 128>}, {transform_indices = @transform_5, window_bounds = array<i64: 96, 256>}]} {
    %c0_i32 = arith.constant 0 : i32
    %0 = arith.cmpi eq, %arg1, %c0_i32 : i32
    %1 = arith.extui %0 : i1 to i32
    %c0_i32_0 = arith.constant 0 : i32
    %2 = arith.cmpi ne, %1, %c0_i32_0 : i32
    scf.if %2 {
      %cst_13 = arith.constant 0.000000e+00 : f32
      %19 = vector.broadcast %cst_13 : f32 to vector<96x128xf32>
      %c0_14 = arith.constant 0 : index
      %c0_15 = arith.constant 0 : index
      %20 = vector.load %arg6[%c0_14, %c0_15] : memref<96x128xf32, #tpu.memory_space<vmem>>, vector<96x128xf32>
      tpu.vector_store %arg6[%c0_14, %c0_15], %19 {strides = array<i32>} : memref<96x128xf32, #tpu.memory_space<vmem>>, vector<96x128xf32>,
    } else {
    }
    %c0 = arith.constant 0 : index
    %c0_1 = arith.constant 0 : index
    %3 = vector.load %arg2[%c0, %c0_1] : memref<96x256xf32, #tpu.memory_space<vmem>>, vector<96x256xf32>
    %c256_i32 = arith.constant 256 : i32
    %4 = arith.muli %arg1, %c256_i32 : i32
    %5 = tpu.assume_multiple %4, 128 : i32
    %6 = arith.index_cast %5 : i32 to index
    %c0_2 = arith.constant 0 : index
    %7 = vector.load %arg5[%6, %c0_2] : memref<256x128xf32, #tpu.memory_space<vmem>>, vector<256x128xf32>
    %c0_3 = arith.constant 0 : index
    %c0_4 = arith.constant 0 : index
    %8 = vector.load %arg6[%c0_3, %c0_4] : memref<96x128xf32, #tpu.memory_space<vmem>>, vector<96x128xf32>
    %cst = arith.constant dense<0.000000e+00> : vector<96x128xf32>
    %9 = tpu.matmul %3, %7, %cst {dimension_numbers = #tpu.dot_dimension_numbers<[1], [0], [0], [1], [0, 0, 1, 1], [], []>} : vector<96x256xf32>, vector<256x128xf32>, vector<96x128xf32> -> vector<96x128xf32>
    %10 = arith.addf %8, %9 : vector<96x128xf32>
    %c0_5 = arith.constant 0 : index
    %c0_6 = arith.constant 0 : index
    %11 = vector.load %arg6[%c0_5, %c0_6] : memref<96x128xf32, #tpu.memory_space<vmem>>, vector<96x128xf32>
    tpu.vector_store %arg6[%c0_5, %c0_6], %10 {strides = array<i32>} : memref<96x128xf32, #tpu.memory_space<vmem>>, vector<96x128xf32>,
    %c0_7 = arith.constant 0 : index
    %c0_8 = arith.constant 0 : index
    %12 = vector.load %arg4[%c0_7, %c0_8] : memref<96x1xf32, #tpu.memory_space<vmem>>, vector<96x1xf32>
    %13 = vector.broadcast %12 : vector<96x1xf32> to vector<96x256xf32>
    %14 = arith.mulf %3, %13 : vector<96x256xf32>
    %c0_9 = arith.constant 0 : index
    %c0_10 = arith.constant 0 : index
    %15 = vector.load %arg7[%c0_9, %c0_10] : memref<96x256xf32, #tpu.memory_space<vmem>>, vector<96x256xf32>
    tpu.vector_store %arg7[%c0_9, %c0_10], %14 {strides = array<i32>} : memref<96x256xf32, #tpu.memory_space<vmem>>, vector<96x256xf32>,
    %c0_i32_11 = arith.constant 0 : i32
    %16 = arith.cmpi eq, %arg1, %c0_i32_11 : i32
    %17 = arith.extui %16 : i1 to i32
    %c0_i32_12 = arith.constant 0 : i32
    %18 = arith.cmpi ne, %17, %c0_i32_12 : i32
    scf.if %18 {
      %c0_13 = arith.constant 0 : index
      %c0_14 = arith.constant 0 : index
      %19 = vector.load %arg6[%c0_13, %c0_14] : memref<96x128xf32, #tpu.memory_space<vmem>>, vector<96x128xf32>
      %c0_15 = arith.constant 0 : index
      %c0_16 = arith.constant 0 : index
      %20 = vector.load %arg3[%c0_15, %c0_16] : memref<96x1xf32, #tpu.memory_space<vmem>>, vector<96x1xf32>
      %21 = vector.broadcast %20 : vector<96x1xf32> to vector<96x128xf32>
      %22 = arith.mulf %19, %21 : vector<96x128xf32>
      %c0_17 = arith.constant 0 : index
      %c0_18 = arith.constant 0 : index
      %23 = vector.load %arg6[%c0_17, %c0_18] : memref<96x128xf32, #tpu.memory_space<vmem>>, vector<96x128xf32>
      tpu.vector_store %arg6[%c0_17, %c0_18], %22 {strides = array<i32>} : memref<96x128xf32, #tpu.memory_space<vmem>>, vector<96x128xf32>,
    } else {
    }
    return
  }
  func.func @transform_0(%arg0: i32, %arg1: i32) -> (i32, i32) {
    %c0_i32 = arith.constant 0 : i32
    return %arg0, %arg1 : i32, i32
  }
  func.func @transform_1(%arg0: i32, %arg1: i32) -> (i32, i32) {
    %c0_i32 = arith.constant 0 : i32
    %c0_i32_0 = arith.constant 0 : i32
    return %arg0, %c0_i32 : i32, i32
  }
  func.func @transform_2(%arg0: i32, %arg1: i32) -> (i32, i32) {
    %c0_i32 = arith.constant 0 : i32
    %c0_i32_0 = arith.constant 0 : i32
    return %arg0, %c0_i32 : i32, i32
  }
  func.func @transform_3(%arg0: i32, %arg1: i32) -> (i32, i32) {
    %c0_i32 = arith.constant 0 : i32
    %c0_i32_0 = arith.constant 0 : i32
    %c0_i32_1 = arith.constant 0 : i32
    return %c0_i32, %c0_i32_0 : i32, i32
  }
  func.func @transform_4(%arg0: i32, %arg1: i32) -> (i32, i32) {
    %c0_i32 = arith.constant 0 : i32
    %c0_i32_0 = arith.constant 0 : i32
    return %arg0, %c0_i32 : i32, i32
  }
  func.func @transform_5(%arg0: i32, %arg1: i32) -> (i32, i32) {
    %c0_i32 = arith.constant 0 : i32
    return %arg0, %arg1 : i32, i32
  }
}

</mosaic_0001>

<bundles_post_ra>
// kernel: tpu_custom_call.1
= control target key start
LH: loop header
LB: loop body
LE: loop exit
PB: predicated region body
PF: predicated region fallthrough
CT: control target
= control target key end

     0   :  { %11 = vsyncpa [#allocation3], 0  ;;  %s1032_s0 = inlined_call_operand.vmem [shape: f32[96,256], index: 0, kind: input, shape index: {}]   ;;  %s1033_s1 = inlined_call_operand.vmem [shape: f32[96,1], index: 1, kind: input, shape index: {}]   ;;  %s1034_s2 = inlined_call_operand.vmem [shape: f32[96,1], index: 2, kind: input, shape index: {}]   ;;  %s1035_s3 = inlined_call_operand.hbm [shape: f32[256,128], index: 3, kind: input, shape index: {}]   ;;  %s1036_s4 = inlined_call_operand.hbm [shape: f32[96,128], index: 4, kind: output, shape index: {0}]   ;;  %s1037_s5 = inlined_call_operand.hbm [shape: f32[96,256], index: 5, kind: output, shape index: {1}]  }
   0x1   :  { %12 = vsyncpa [#allocation4], 0 }
   0x2   :  { %13 = vsyncpa [#allocation7], 0  ;;  %s733_s18 = smov [#allocation2]   ;;  %s661_s22 = scalar_lea.hbm %s1035_s3, 4096 }
   0x3   :  { %s25_s19 = sshll.u32 %s733_s18, 4  ;;  %p662_p0 = scmp.ne.s32.totalorder %s1035_s3, %s661_s22  ;;  %s26_s19 = int_to_ptr.vmem [resolvable:$true] %s25_s19 }
   0x4   :  { %p665_p1 = scmp.lt.u32.totalorder %s661_s22, %s1035_s3 }
   0x6   :  { %p667_p2 = pnand %p665_p1, %p662_p0 }
   0x8   :  { %670 = shalt.err (!%p667_p2)
}
   0x9   :  { %s671_s27 = scalar_lea.vmem %s26_s19, 4096  ;;  %p676_p4 = scmp.lt.s32.totalorder %s26_s19, %s26_s19 }
   0xa   :  { %p672_p3 = scmp.ne.s32.totalorder %s26_s19, %s671_s27  ;;  %p677_p5 = scmp.lt.s32.totalorder %s671_s27, %s671_s27 }
   0xc   :  { %p678_p6 = por %p677_p5, %p676_p4 }
   0xe   :  { %p679_p7 = pnand %p678_p6, %p672_p3 }
  0x10   :  { %682 = shalt.err (!%p679_p7)
}
  0x11   :  { %s734_s28 = smov 128   ;;  %s735_s29 = smov 8  }
  0x12   :  { %31 = dma.hbm_to_vmem [thread:$0]  %s1035_s3, 4096, %s26_s19, [#allocation3], %s734_s28, %s734_s28, %s735_s29  }
  0x13   :  { %727 = dma.done.wait [#allocation3], 4096  }
  0x14   :  { %728 = vsyncadd [#allocation3], 4294963200  ;;  %v736_v0 = vmov 0   ;;  %v93_v1 = vld [vmem:[#allocation2 + $0x80] sm:$0xff]  ;;  %v94_v2 = vld [vmem:[#allocation2 + $0x88] sm:$0xff] }
  0x15   :  { %660 = vset.pattern.permute.xlu1 %v736_v0  ;;  %659 = vset.pattern.permute.xlu0 %v736_v0  ;;  %v77_v3 = vld [vmem:[#allocation2] sm:$0xff]  ;;  %v602_v4 = vpack.c.bf16 %v94_v2, %v93_v1  ;;  %v78_v5 = vld [vmem:[#allocation2 + $0x8] sm:$0xff]  ;;  %v95_v6 = vld [vmem:[#allocation2 + $0x90] sm:$0xff] }
  0x16   :  { %v96_v7 = vld [vmem:[#allocation2 + $0x98] sm:$0xff]  ;;  %v604_v8 = vpack.c.bf16 %v78_v5, %v77_v3  ;;  %v79_v10 = vld [vmem:[#allocation2 + $0x10] sm:$0xff]  ;;  %v97_v12 = vld [vmem:[#allocation2 + $0xa0] sm:$0xff] }
  0x17   :  { %v606_v9 = vpack.c.bf16 %v96_v7, %v95_v6  ;;  %v80_v11 = vld [vmem:[#allocation2 + $0x18] sm:$0xff]  ;;  %603 = vmatprep.subr.bf16.mxu0 %v602_v4  ;;  %634 = vmatprep.subr.bf16.mxu1 %v602_v4  ;;  %v98_v13 = vld [vmem:[#allocation2 + $0xa8] sm:$0xff]  ;;  %v81_v16 = vld [vmem:[#allocation2 + $0x20] sm:$0xff] }
  0x18   :  { %605 = vmatpush3.bf16.msra.mxu0 %v604_v8  ;;  %642 = vmatpush3.bf16.msra.mxu1 %v604_v8  ;;  %v608_v14 = vpack.c.bf16 %v80_v11, %v79_v10  ;;  %v610_v15 = vpack.c.bf16 %v98_v13, %v97_v12  ;;  %v82_v17 = vld [vmem:[#allocation2 + $0x28] sm:$0xff]  ;;  %v99_v18 = vld [vmem:[#allocation2 + $0xb0] sm:$0xff]  ;;  %v100_v19 = vld [vmem:[#allocation2 + $0xb8] sm:$0xff] }
  0x19   :  { %607 = vmatprep.subr.bf16.mxu0 %v606_v9  ;;  %635 = vmatprep.subr.bf16.mxu1 %v606_v9  ;;  %v612_v20 = vpack.c.bf16 %v82_v17, %v81_v16  ;;  %v614_v21 = vpack.c.bf16 %v100_v19, %v99_v18  ;;  %v83_v22 = vld [vmem:[#allocation2 + $0x30] sm:$0xff]  ;;  %v84_v23 = vld [vmem:[#allocation2 + $0x38] sm:$0xff]  ;;  %v101_v24 = vld [vmem:[#allocation2 + $0xc0] sm:$0xff] }
  0x1a   :  { %v102_v25 = vld [vmem:[#allocation2 + $0xc8] sm:$0xff]  ;;  %v616_v28 = vpack.c.bf16 %v84_v23, %v83_v22  ;;  %v85_v30 = vld [vmem:[#allocation2 + $0x40] sm:$0xff]  ;;  %v103_v32 = vld [vmem:[#allocation2 + $0xd0] sm:$0xff] }
  0x1b   :  { %v789_v26 = vld [vmem:[%s1032_s0 + $0x8] sm:$0xff]  ;;  %v618_v29 = vpack.c.bf16 %v102_v25, %v101_v24  ;;  %v104_v33 = vld [vmem:[#allocation2 + $0xd8] sm:$0xff]  ;;  %v87_v36 = vld [vmem:[#allocation2 + $0x50] sm:$0xff] }
  0x1c   :  { %609 = vmatpush3.bf16.msra.mxu0 %v608_v14  ;;  %643 = vmatpush3.bf16.msra.mxu1 %v608_v14  ;;  %v795_v27 = vld [vmem:[%s1032_s0 + $0x68] sm:$0xff]  ;;  %v622_v35 = vpack.c.bf16 %v104_v33, %v103_v32  ;;  %v88_v37 = vld [vmem:[#allocation2 + $0x58] sm:$0xff]  ;;  %v105_v38 = vld [vmem:[#allocation2 + $0xe0] sm:$0xff] }
  0x1d   :  { %611 = vmatprep.subr.bf16.mxu0 %v610_v15  ;;  %636 = vmatprep.subr.bf16.mxu1 %v610_v15  ;;  %v86_v31 = vld [vmem:[#allocation2 + $0x48] sm:$0xff]  ;;  %v272_v40 = vld [vmem:[%s1034_s2 + $0x10] sm:$0xff]  ;;  %v270_v41 = vld [vmem:[%s1034_s2] sm:$0xff]  ;;  %v624_v42 = vpack.c.bf16 %v88_v37, %v87_v36 }
  0x1e   :  { %185 = vmatprep.mubr.f32.mxu0 %v789_v26  ;;  %215 = vmatprep.mubr.f32.mxu1 %v795_v27  ;;  %v620_v34 = vpack.c.bf16 %v86_v31, %v85_v30  ;;  %v106_v39 = vld [vmem:[#allocation2 + $0xe8] sm:$0xff]  ;;  %v273_v43 = vld [vmem:[%s1034_s2 + $0x18] sm:$0xff]  ;;  %v89_v45 = vld [vmem:[#allocation2 + $0x60] sm:$0xff] }
  0x1f   :  { %294 = vperm.xlu1 %660, %v272_v40   ;;  %v626_v44 = vpack.c.bf16 %v106_v39, %v105_v38  ;;  %v90_v46 = vld [vmem:[#allocation2 + $0x68] sm:$0xff]  ;;  %v107_v47 = vld [vmem:[#allocation2 + $0xf0] sm:$0xff]  ;;  %v108_v48 = vld [vmem:[#allocation2 + $0xf8] sm:$0xff]  ;;  %284 = vperm.xlu0 %659, %v270_v41  }
  0x20   :  { %613 = vmatpush3.bf16.msra.mxu0 %v612_v20  ;;  %644 = vmatpush3.bf16.msra.mxu1 %v612_v20  ;;  %v271_v49 = vld [vmem:[%s1034_s2 + $0x8] sm:$0xff]  ;;  %v628_v50 = vpack.c.bf16 %v90_v46, %v89_v45  ;;  %v630_v52 = vpack.c.bf16 %v108_v48, %v107_v47  ;;  %v91_v53 = vld [vmem:[#allocation2 + $0x70] sm:$0xff]  ;;  %v92_v54 = vld [vmem:[#allocation2 + $0x78] sm:$0xff] }
  0x21   :  { %615 = vmatprep.subr.bf16.mxu0 %v614_v21  ;;  %637 = vmatprep.subr.bf16.mxu1 %v614_v21  ;;  %v275_v51 = vld [vmem:[%s1034_s2 + $0x28] sm:$0xff]  ;;  %v274_v55 = vld [vmem:[%s1034_s2 + $0x20] sm:$0xff]  ;;  %v632_v56 = vpack.c.bf16 %v92_v54, %v91_v53  ;;  %v277_v57 = vld [vmem:[%s1034_s2 + $0x38] sm:$0xff] }
  0x22   :  { %v276_v58 = vld [vmem:[%s1034_s2 + $0x30] sm:$0xff]  ;;  %v825_v59 = vld [vmem:[%s1032_s0] sm:$0xff]  ;;  %v835_v61 = vld [vmem:[%s1032_s0 + $0x18] sm:$0xff] }
  0x23   :  { %299 = vperm.xlu1 %660, %v273_v43   ;;  %289 = vperm.xlu0 %659, %v271_v49   ;;  %v830_v60 = vld [vmem:[%s1032_s0 + $0x60] sm:$0xff]  ;;  %v840_v62 = vld [vmem:[%s1032_s0 + $0x78] sm:$0xff]  ;;  %v279_v63 = vld [vmem:[%s1034_s2 + $0x48] sm:$0xff] }
  0x24   :  { %617 = vmatpush3.bf16.msra.mxu0 %v616_v28  ;;  %645 = vmatpush3.bf16.msra.mxu1 %v616_v28  ;;  %v278_v0 = vld [vmem:[%s1034_s2 + $0x40] sm:$0xff]  ;;  %v855_v1 = vld [vmem:[%s1032_s0 + $0x10] sm:$0xff]  ;;  %v865_v3 = vld [vmem:[%s1032_s0 + $0x28] sm:$0xff] }
  0x25   :  { %619 = vmatprep.subr.bf16.mxu0 %v618_v29  ;;  %638 = vmatprep.subr.bf16.mxu1 %v618_v29  ;;  %v860_v2 = vld [vmem:[%s1032_s0 + $0x70] sm:$0xff]  ;;  %v870_v4 = vld [vmem:[%s1032_s0 + $0x88] sm:$0xff]  ;;  %v281_v5 = vld [vmem:[%s1034_s2 + $0x58] sm:$0xff] }
  0x26   :  { %v280_v6 = vld [vmem:[%s1034_s2 + $0x50] sm:$0xff]  ;;  %v55_v7 = vld [vmem:[%s1032_s0 + $0x20] sm:$0xff]  ;;  %v58_v9 = vld [vmem:[%s1032_s0 + $0x38] sm:$0xff] }
  0x27   :  { %309 = vperm.xlu1 %660, %v275_v51   ;;  %304 = vperm.xlu0 %659, %v274_v55   ;;  %v888_v8 = vld [vmem:[%s1032_s0 + $0x80] sm:$0xff]  ;;  %v896_v10 = vld [vmem:[%s1032_s0 + $0x98] sm:$0xff]  ;;  %v406_v11 = vld [vmem:[%s1033_s1 + $0x8] sm:$0xff] }
  0x28   :  { %621 = vmatpush3.bf16.msra.mxu0 %v620_v34  ;;  %646 = vmatpush3.bf16.msra.mxu1 %v620_v34  ;;  %v405_v12 = vld [vmem:[%s1033_s1] sm:$0xff]  ;;  %v57_v13 = vld [vmem:[%s1032_s0 + $0x30] sm:$0xff]  ;;  %v917_v15 = vld [vmem:[%s1032_s0 + $0x48] sm:$0xff] }
  0x29   :  { %623 = vmatprep.subr.bf16.mxu0 %v622_v35  ;;  %639 = vmatprep.subr.bf16.mxu1 %v622_v35  ;;  %v912_v14 = vld [vmem:[%s1032_s0 + $0x90] sm:$0xff]  ;;  %v922_v16 = vld [vmem:[%s1032_s0 + $0xa8] sm:$0xff]  ;;  %v408_v17 = vld [vmem:[%s1033_s1 + $0x18] sm:$0xff] }
  0x2a   :  { %v407_v18 = vld [vmem:[%s1033_s1 + $0x10] sm:$0xff]  ;;  %v59_v19 = vld [vmem:[%s1032_s0 + $0x40] sm:$0xff]  ;;  %v62_v21 = vld [vmem:[%s1032_s0 + $0x58] sm:$0xff] }
  0x2b   :  { %319 = vperm.xlu1 %660, %v277_v57   ;;  %314 = vperm.xlu0 %659, %v276_v58   ;;  %v939_v20 = vld [vmem:[%s1032_s0 + $0xa0] sm:$0xff]  ;;  %v947_v22 = vld [vmem:[%s1032_s0 + $0xb8] sm:$0xff]  ;;  %v410_v23 = vld [vmem:[%s1033_s1 + $0x28] sm:$0xff] }
  0x2c   :  { %625 = vmatpush3.bf16.msra.mxu0 %v624_v42  ;;  %647 = vmatpush3.bf16.msra.mxu1 %v624_v42  ;;  %v409_v24 = vld [vmem:[%s1033_s1 + $0x20] sm:$0xff]  ;;  %v61_v25 = vld [vmem:[%s1032_s0 + $0x50] sm:$0xff]  ;;  %v412_v29 = vld [vmem:[%s1033_s1 + $0x38] sm:$0xff] }
  0x2d   :  { %627 = vmatprep.subr.bf16.mxu0 %v626_v44  ;;  %640 = vmatprep.subr.bf16.mxu1 %v626_v44  ;;  %v963_v28 = vld [vmem:[%s1032_s0 + $0xb0] sm:$0xff]  ;;  %v414_v31 = vld [vmem:[%s1033_s1 + $0x48] sm:$0xff]  ;;  %v413_v32 = vld [vmem:[%s1033_s1 + $0x40] sm:$0xff] }
  0x2e   :  { %v411_v30 = vld [vmem:[%s1033_s1 + $0x30] sm:$0xff]  ;;  %v416_v33 = vld [vmem:[%s1033_s1 + $0x58] sm:$0xff] }
  0x2f   :  { %329 = vperm.xlu1 %660, %v279_v63   ;;  %324 = vperm.xlu0 %659, %v278_v0   ;;  %v415_v34 = vld [vmem:[%s1033_s1 + $0x50] sm:$0xff]  ;;  %s737_s1 = smov [#allocation6]  }
  0x30   :  { %629 = vmatpush3.bf16.msra.mxu0 %v628_v50  ;;  %648 = vmatpush3.bf16.msra.mxu1 %v628_v50  ;;  %s518_s27 = sshll.u32 %s737_s1, 4  ;;  %s519_s27 = int_to_ptr.vmem [resolvable:$true] %s518_s27 }
  0x31   :  { %631 = vmatprep.subr.bf16.mxu0 %v630_v52  ;;  %641 = vmatprep.subr.bf16.mxu1 %v630_v52  ;;  %s683_s30 = scalar_lea.vmem %s519_s27, 3072  ;;  %p688_p9 = scmp.lt.s32.totalorder %s519_s27, %s519_s27 }
  0x32   :  { %p684_p8 = scmp.ne.s32.totalorder %s519_s27, %s683_s30  ;;  %p689_p10 = scmp.lt.s32.totalorder %s683_s30, %s683_s30 }
  0x33   :  { %339 = vperm.xlu1 %660, %v281_v5   ;;  %334 = vperm.xlu0 %659, %v280_v6  }
  0x34   :  { %633 = vmatpush3.bf16.msra.mxu0 %v632_v56  ;;  %649 = vmatpush3.bf16.msra.mxu1 %v632_v56  ;;  %p690_p11 = por %p689_p10, %p688_p9 }
  0x36   :  { %p691_p12 = pnand %p690_p11, %p684_p8 }
  0x37   :  { %186 = vmatmul.mubr.f32.vlgmr.msra.gmra.mrb[0].mxu0 %v825_v59  ;;  %216 = vmatmul.mubr.f32.vlgmr.msra.gmra.mrb[0].mxu1 %v830_v60 }
  0x38   :  { %190 = vmatprep.mubr.f32.mxu0 %v835_v61  ;;  %220 = vmatprep.mubr.f32.mxu1 %v840_v62 }
  0x39   :  { %424 = vperm.xlu1 %660, %v406_v11   ;;  %419 = vperm.xlu0 %659, %v405_v12  }
  0x3b   :  { %191 = vmatmul.mubr.f32.gmra.mrb[2].mxu0 %v855_v1  ;;  %221 = vmatmul.mubr.f32.gmra.mrb[2].mxu1 %v860_v2 }
  0x3c   :  { %195 = vmatprep.mubr.f32.mxu0 %v865_v3  ;;  %225 = vmatprep.mubr.f32.mxu1 %v870_v4 }
  0x3d   :  { %434 = vperm.xlu1 %660, %v408_v17   ;;  %429 = vperm.xlu0 %659, %v407_v18  }
  0x3f   :  { %196 = vmatmul.mubr.f32.gmra.mrb[4].mxu0 %v55_v7  ;;  %226 = vmatmul.mubr.f32.gmra.mrb[4].mxu1 %v888_v8 }
  0x40   :  { %200 = vmatprep.mubr.f32.mxu0 %v58_v9  ;;  %230 = vmatprep.mubr.f32.mxu1 %v896_v10 }
  0x41   :  { %444 = vperm.xlu1 %660, %v410_v23   ;;  %439 = vperm.xlu0 %659, %v409_v24  }
  0x43   :  { %201 = vmatmul.mubr.f32.gmra.mrb[6].mxu0 %v57_v13  ;;  %231 = vmatmul.mubr.f32.gmra.mrb[6].mxu1 %v912_v14 }
  0x44   :  { %205 = vmatprep.mubr.f32.mxu0 %v917_v15  ;;  %235 = vmatprep.mubr.f32.mxu1 %v922_v16 }
  0x45   :  { %454 = vperm.xlu1 %660, %v412_v29   ;;  %449 = vperm.xlu0 %659, %v411_v30  }
  0x47   :  { %206 = vmatmul.mubr.f32.gmra.mrb[8].mxu0 %v59_v19  ;;  %236 = vmatmul.mubr.f32.gmra.mrb[8].mxu1 %v939_v20 }
  0x48   :  { %210 = vmatprep.mubr.f32.mxu0 %v62_v21  ;;  %240 = vmatprep.mubr.f32.mxu1 %v947_v22 }
  0x49   :  { %464 = vperm.xlu1 %660, %v414_v31   ;;  %459 = vperm.xlu0 %659, %v413_v32  }
  0x4b   :  { %211 = vmatmul.mubr.f32.gmra.mrb[10].mxu0 %v61_v25  ;;  %241 = vmatmul.mubr.f32.gmra.mrb[10].mxu1 %v963_v28 }
  0x4d   :  { %474 = vperm.xlu1 %660, %v416_v33   ;;  %469 = vperm.xlu0 %659, %v415_v34  }
  0x9e   :  { %v295_v35 = vpop.permute.xlu1 %294  ;;  %v285_v38 = vpop.permute.xlu0 %284 }
  0x9f   :  { %v346_v36 = vmul.f32 %v295_v35, %v55_v7  ;;  %v347_v37 = vmul.f32 %v295_v35, %v865_v3  ;;  %v342_v39 = vmul.f32 %v285_v38, %v825_v59  ;;  %v343_v40 = vmul.f32 %v285_v38, %v789_v26 }
  0xa1   :  { %370 = vst [vmem:[#allocation6 + $0x20] sm:$0xff] %v346_v36  ;;  %371 = vst [vmem:[#allocation6 + $0x28] sm:$0xff] %v347_v37 }
  0xa2   :  { %v300_v41 = vpop.permute.xlu1 %299  ;;  %366 = vst [vmem:[#allocation6] sm:$0xff] %v342_v39  ;;  %367 = vst [vmem:[#allocation6 + $0x8] sm:$0xff] %v343_v40  ;;  %v290_v44 = vpop.permute.xlu0 %289 }
  0xa3   :  { %v348_v42 = vmul.f32 %v300_v41, %v57_v13  ;;  %v349_v43 = vmul.f32 %v300_v41, %v58_v9  ;;  %v344_v45 = vmul.f32 %v290_v44, %v855_v1  ;;  %v345_v46 = vmul.f32 %v290_v44, %v835_v61 }
  0xa5   :  { %372 = vst [vmem:[#allocation6 + $0x30] sm:$0xff] %v348_v42  ;;  %373 = vst [vmem:[#allocation6 + $0x38] sm:$0xff] %v349_v43 }
  0xa6   :  { %v310_v47 = vpop.permute.xlu1 %309  ;;  %368 = vst [vmem:[#allocation6 + $0x10] sm:$0xff] %v344_v45  ;;  %369 = vst [vmem:[#allocation6 + $0x18] sm:$0xff] %v345_v46  ;;  %v305_v26 = vpop.permute.xlu0 %304 }
  0xa7   :  { %v352_v48 = vmul.f32 %v310_v47, %v61_v25  ;;  %v353_v49 = vmul.f32 %v310_v47, %v62_v21  ;;  %v350_v50 = vmul.f32 %v305_v26, %v59_v19  ;;  %v351_v51 = vmul.f32 %v305_v26, %v917_v15 }
  0xa9   :  { %376 = vst [vmem:[#allocation6 + $0x50] sm:$0xff] %v352_v48  ;;  %377 = vst [vmem:[#allocation6 + $0x58] sm:$0xff] %v353_v49 }
  0xaa   :  { %v320_v52 = vpop.permute.xlu1 %319  ;;  %374 = vst [vmem:[#allocation6 + $0x40] sm:$0xff] %v350_v50  ;;  %375 = vst [vmem:[#allocation6 + $0x48] sm:$0xff] %v351_v51  ;;  %v315_v55 = vpop.permute.xlu0 %314 }
  0xab   :  { %v356_v53 = vmul.f32 %v320_v52, %v860_v2  ;;  %v357_v54 = vmul.f32 %v320_v52, %v840_v62  ;;  %v354_v56 = vmul.f32 %v315_v55, %v830_v60  ;;  %v355_v57 = vmul.f32 %v315_v55, %v795_v27 }
  0xad   :  { %380 = vst [vmem:[#allocation6 + $0x70] sm:$0xff] %v356_v53  ;;  %381 = vst [vmem:[#allocation6 + $0x78] sm:$0xff] %v357_v54 }
  0xae   :  { %378 = vst [vmem:[#allocation6 + $0x60] sm:$0xff] %v354_v56  ;;  %379 = vst [vmem:[#allocation6 + $0x68] sm:$0xff] %v355_v57  ;;  %v330_v58 = vpop.permute.xlu1 %329  ;;  %v325_v63 = vpop.permute.xlu0 %324 }
  0xaf   :  { %v360_v59 = vmul.f32 %v330_v58, %v912_v14  ;;  %v361_v61 = vmul.f32 %v330_v58, %v896_v10  ;;  %v358_v0 = vmul.f32 %v325_v63, %v888_v8  ;;  %v359_v62 = vmul.f32 %v325_v63, %v870_v4 }
  0xb1   :  { %384 = vst [vmem:[#allocation6 + $0x90] sm:$0xff] %v360_v59  ;;  %385 = vst [vmem:[#allocation6 + $0x98] sm:$0xff] %v361_v61 }
  0xb2   :  { %382 = vst [vmem:[#allocation6 + $0x80] sm:$0xff] %v358_v0  ;;  %383 = vst [vmem:[#allocation6 + $0x88] sm:$0xff] %v359_v62  ;;  %v340_v60 = vpop.permute.xlu1 %339  ;;  %v335_v2 = vpop.permute.xlu0 %334 }
  0xb3   :  { %v364_v27 = vmul.f32 %v340_v60, %v963_v28  ;;  %v365_v1 = vmul.f32 %v340_v60, %v947_v22  ;;  %v362_v3 = vmul.f32 %v335_v2, %v939_v20  ;;  %v363_v5 = vmul.f32 %v335_v2, %v922_v16 }
  0xb5   :  { %388 = vst [vmem:[#allocation6 + $0xb0] sm:$0xff] %v364_v27  ;;  %389 = vst [vmem:[#allocation6 + $0xb8] sm:$0xff] %v365_v1 }
  0xb6   :  { %386 = vst [vmem:[#allocation6 + $0xa0] sm:$0xff] %v362_v3  ;;  %387 = vst [vmem:[#allocation6 + $0xa8] sm:$0xff] %v363_v5 }
  0xb7   :  { %694 = shalt.err (!%p691_p12)
}
  0xb8   :  { %s695_s7 = scalar_lea.hbm %s1037_s5, 3072 }
  0xb9   :  { %p696_p13 = scmp.ne.s32.totalorder %s1037_s5, %s695_s7  ;;  %p699_p0 = scmp.lt.u32.totalorder %s695_s7, %s1037_s5 }
  0xbb   :  { %p701_p1 = pnand %p699_p0, %p696_p13 }
  0xbd   :  { %704 = shalt.err (!%p701_p1)
}
  0xbe   :  { %s738_s11 = smov 256   ;;  %s739_s12 = smov 16   ;;  %v420_v4 = vpop.permute.xlu0 %419  ;;  %v425_v6 = vpop.permute.xlu1 %424 }
  0xbf   :  { %524 = dma.vmem_to_hbm [thread:$0]  %s519_s27, 3072, %s1037_s5, [#allocation7], %s738_s11, %s738_s11, %s739_s12  }
  0xc0   :  { %s740_s5 = smov [#allocation5]  }
  0xc1   :  { %s506_s15 = sshll.u32 %s740_s5, 4  ;;  %s507_s15 = int_to_ptr.vmem [resolvable:$true] %s506_s15 }
  0xc2   :  { %v430_v7 = vpop.permute.xlu0 %429  ;;  %v435_v8 = vpop.permute.xlu1 %434  ;;  %s705_s16 = scalar_lea.vmem %s507_s15, 1536  ;;  %p710_p3 = scmp.lt.s32.totalorder %s507_s15, %s507_s15 }
  0xc3   :  { %p706_p2 = scmp.ne.s32.totalorder %s507_s15, %s705_s16  ;;  %p711_p4 = scmp.lt.s32.totalorder %s705_s16, %s705_s16 }
  0xc5   :  { %p712_p5 = por %p711_p4, %p710_p3 }
  0xc6   :  { %v440_v9 = vpop.permute.xlu0 %439  ;;  %v1014_v10 = vpop.permute.xlu1 %444 }
  0xc7   :  { %p713_p6 = pnand %p712_p5, %p706_p2 }
  0xca   :  { %v450_v17 = vpop.permute.xlu0 %449  ;;  %v455_v28 = vpop.permute.xlu1 %454 }
  0xce   :  { %v460_v37 = vpop.permute.xlu0 %459  ;;  %v465_v46 = vpop.permute.xlu1 %464 }
  0xd2   :  { %v470_v54 = vpop.permute.xlu0 %469  ;;  %v475_v62 = vpop.permute.xlu1 %474 }
 0x10a   :  { %v566_v11 = vpop.f32.mrb[0].mxu0  ;;  %v584_v12 = vpop.f32.mrb[0].mxu1 }
 0x10b   :  { %v567_v13 = vpop.f32.mrb[1].mxu0  ;;  %v585_v14 = vpop.f32.mrb[1].mxu1 }
 0x10c   :  { %v568_v15 = vadd.f32 %v567_v13, %v566_v11  ;;  %v586_v16 = vadd.f32 %v585_v14, %v584_v12 }
 0x10e   :  { %v569_v18 = vpop.f32.mrb[2].mxu0  ;;  %v587_v19 = vpop.f32.mrb[2].mxu1  ;;  %v477_v22 = vmul.f32 %v568_v15, %v420_v4  ;;  %v483_v23 = vmul.f32 %v586_v16, %v450_v17 }
 0x10f   :  { %v570_v20 = vpop.f32.mrb[3].mxu0  ;;  %v588_v21 = vpop.f32.mrb[3].mxu1 }
 0x110   :  { %v571_v24 = vadd.f32 %v570_v20, %v569_v18  ;;  %v589_v25 = vadd.f32 %v588_v21, %v587_v19  ;;  %489 = vst [vmem:[#allocation5] sm:$0xff] %v477_v22  ;;  %495 = vst [vmem:[#allocation5 + $0x30] sm:$0xff] %v483_v23 }
 0x112   :  { %v572_v29 = vpop.f32.mrb[4].mxu0  ;;  %v590_v30 = vpop.f32.mrb[4].mxu1  ;;  %v478_v33 = vmul.f32 %v571_v24, %v425_v6  ;;  %v484_v34 = vmul.f32 %v589_v25, %v455_v28 }
 0x113   :  { %v573_v31 = vpop.f32.mrb[5].mxu0  ;;  %v591_v32 = vpop.f32.mrb[5].mxu1 }
 0x114   :  { %v574_v35 = vadd.f32 %v573_v31, %v572_v29  ;;  %v592_v36 = vadd.f32 %v591_v32, %v590_v30  ;;  %490 = vst [vmem:[#allocation5 + $0x8] sm:$0xff] %v478_v33  ;;  %496 = vst [vmem:[#allocation5 + $0x38] sm:$0xff] %v484_v34 }
 0x116   :  { %v575_v38 = vpop.f32.mrb[6].mxu0  ;;  %v593_v39 = vpop.f32.mrb[6].mxu1  ;;  %v479_v42 = vmul.f32 %v574_v35, %v430_v7  ;;  %v485_v43 = vmul.f32 %v592_v36, %v460_v37 }
 0x117   :  { %v576_v40 = vpop.f32.mrb[7].mxu0  ;;  %v594_v41 = vpop.f32.mrb[7].mxu1 }
 0x118   :  { %v577_v44 = vadd.f32 %v576_v40, %v575_v38  ;;  %v595_v45 = vadd.f32 %v594_v41, %v593_v39  ;;  %491 = vst [vmem:[#allocation5 + $0x10] sm:$0xff] %v479_v42  ;;  %497 = vst [vmem:[#allocation5 + $0x40] sm:$0xff] %v485_v43 }
 0x11a   :  { %v578_v47 = vpop.f32.mrb[8].mxu0  ;;  %v596_v48 = vpop.f32.mrb[8].mxu1  ;;  %v480_v50 = vmul.f32 %v577_v44, %v435_v8  ;;  %v486_v51 = vmul.f32 %v595_v45, %v465_v46 }
 0x11b   :  { %v579_v49 = vpop.f32.mrb[9].mxu0  ;;  %v597_v26 = vpop.f32.mrb[9].mxu1 }
 0x11c   :  { %v580_v52 = vadd.f32 %v579_v49, %v578_v47  ;;  %v598_v53 = vadd.f32 %v597_v26, %v596_v48  ;;  %492 = vst [vmem:[#allocation5 + $0x18] sm:$0xff] %v480_v50  ;;  %498 = vst [vmem:[#allocation5 + $0x48] sm:$0xff] %v486_v51 }
 0x11e   :  { %v581_v55 = vpop.f32.mrb[10].mxu0  ;;  %v599_v56 = vpop.f32.mrb[10].mxu1  ;;  %v481_v59 = vmul.f32 %v580_v52, %v440_v9  ;;  %v487_v61 = vmul.f32 %v598_v53, %v470_v54 }
 0x11f   :  { %v582_v57 = vpop.f32.mrb[11].mxu0  ;;  %v600_v58 = vpop.f32.mrb[11].mxu1 }
 0x120   :  { %v583_v63 = vadd.f32 %v582_v57, %v581_v55  ;;  %v601_v0 = vadd.f32 %v600_v58, %v599_v56  ;;  %493 = vst [vmem:[#allocation5 + $0x20] sm:$0xff] %v481_v59  ;;  %499 = vst [vmem:[#allocation5 + $0x50] sm:$0xff] %v487_v61 }
 0x122   :  { %v482_v60 = vmul.f32 %v583_v63, %v1014_v10  ;;  %v488_v27 = vmul.f32 %v601_v0, %v475_v62 }
 0x124   :  { %494 = vst [vmem:[#allocation5 + $0x28] sm:$0xff] %v482_v60  ;;  %500 = vst [vmem:[#allocation5 + $0x58] sm:$0xff] %v488_v27 }
 0x125   :  { %716 = shalt.err (!%p713_p6)
}
 0x126   :  { %s717_s19 = scalar_lea.hbm %s1036_s4, 1536 }
 0x127   :  { %p718_p7 = scmp.ne.s32.totalorder %s1036_s4, %s717_s19  ;;  %p721_p8 = scmp.lt.u32.totalorder %s717_s19, %s1036_s4 }
 0x129   :  { %p723_p9 = pnand %p721_p8, %p718_p7 }
 0x12b   :  { %726 = shalt.err (!%p723_p9)
}
 0x12c   :  { %512 = dma.vmem_to_hbm [thread:$0]  %s507_s15, 1536, %s1036_s4, [#allocation4], %s734_s28, %s734_s28, %s735_s29  }
 0x12d   :  { %729 = dma.done.wait [#allocation4], 1536  }
 0x12e   :  { %730 = vsyncadd [#allocation4], 4294965760 }
 0x12f   :  { %731 = dma.done.wait [#allocation7], 3072  }
 0x130   :  { %732 = vsyncadd [#allocation7], 4294964224 }
 0x131   :  { %531 = vsyncpa [#allocation3], 1 }
 0x132   :  { %532 = vsyncpa [#allocation4], 1 }
 0x133   :  { %533 = vsyncpa [#allocation7], 1 }

</bundles_post_ra>
